<compile_context>
chip_gen: v6e
topology: v6e:2x2x1
jax: 0.10.0
libtpu: 0.0.40
codegen_flags: <defaults>
</compile_context>

<pallas_src>
import functools

import jax
import jax.numpy as jnp
from jax.experimental import pallas as pl
from jax.experimental.pallas import tpu as pltpu


def _aux_loss_kernel(x_ref, w_ref, b_ref, lab_ref, out_ref, acc_ref, *, n_total):
    c = pl.program_id(0)          # reduction-chain (core) index
    s = pl.program_id(1)          # step within this chain
    steps = pl.num_programs(1)
    tile_n = x_ref.shape[0]

    @pl.when(s == 0)
    def _():
        acc_ref[...] = jnp.zeros_like(acc_ref)

    # d = logit_1 - logit_0 per row: (tile_n, 128) @ (128, 1) on the MXU, f32 accumulate.
    d = jnp.dot(x_ref[...], w_ref[...],
                preferred_element_type=jnp.float32) + b_ref[...]        # (tile_n, 1)

    # Two-class softmax CE == binary CE:  loss = softplus((1 - 2*label) * d)
    sign = 1.0 - 2.0 * lab_ref[...].astype(jnp.float32)                 # (tile_n, 1)
    z = sign * d

    # Mask rows past the logical end (edge / phantom blocks). Use the *unclamped*
    # logical row index so clamped re-reads contribute exactly zero.
    row = (c * steps + s) * tile_n + jax.lax.broadcasted_iota(
        jnp.int32, (tile_n, 1), 0)
    valid = row < n_total
    z = jnp.where(valid, z, 0.0)                                        # keep exp finite

    # Stable softplus: max(z,0) + log(1 + exp(-|z|))
    sp = jnp.maximum(z, 0.0) + jnp.log(1.0 + jnp.exp(-jnp.abs(z)))
    acc_ref[...] += jnp.sum(jnp.where(valid, sp, 0.0))

    @pl.when(s == steps - 1)
    def _():
        # Single lane-dense store of this chain's partial sum.
        out_ref[...] = jnp.broadcast_to(acc_ref[...], out_ref.shape)


def aux_visual_loss(x, labels, weight, bias, *, tile_n=2048):
    """Fused Linear(128,2) + CrossEntropyLoss(mean).

    x: (..., 128) float (f32 or bf16 — streamed as-is, no upcast pass)
    labels: (...) int in {0, 1}
    weight: (2, 128)  (nn.Linear layout), bias: (2,)
    """
    x2 = x.reshape(-1, 128)
    n = x2.shape[0]
    lab2 = labels.reshape(-1, 1).astype(jnp.int32)

    # Collapse the 2-class head: only the logit difference matters.
    w_diff = (weight[1, :] - weight[0, :]).reshape(128, 1).astype(x2.dtype)
    b_diff = (bias[1] - bias[0]).reshape(1, 1).astype(jnp.float32)

    tile_n = min(tile_n, n)                       # small inputs: one full-array block
    num_blocks = pl.cdiv(n, tile_n)
    num_splits = 2                                # v7x: one reduction chain per TensorCore
    steps = pl.cdiv(num_blocks, num_splits)

    def row_map(c, s):
        # Clamp so phantom tail steps re-read an in-bounds block; the kernel masks
        # them out via the unclamped logical row index.
        return (jnp.minimum(c * steps + s, num_blocks - 1), 0)

    out = pl.pallas_call(
        functools.partial(_aux_loss_kernel, n_total=n),
        out_shape=jax.ShapeDtypeStruct((num_splits * 8, 128), jnp.float32),
        grid_spec=pltpu.PrefetchScalarGridSpec(
            num_scalar_prefetch=0,
            grid=(num_splits, steps),
            in_specs=[
                pl.BlockSpec((tile_n, 128), row_map),          # x tile (streamed)
                pl.BlockSpec((128, 1), lambda c, s: (0, 0)),   # w1 - w0 (resident)
                pl.BlockSpec((1, 1), lambda c, s: (0, 0)),     # b1 - b0
                pl.BlockSpec((tile_n, 1), row_map),            # labels tile
            ],
            out_specs=pl.BlockSpec((8, 128), lambda c, s: (c, 0)),  # per-chain partial sum
            scratch_shapes=[pltpu.VMEM((1, 1), jnp.float32)],
        ),
        compiler_params=pltpu.CompilerParams(
            dimension_semantics=("parallel", "arbitrary")),
    )(x2, w_diff, b_diff, lab2)

    # Tiny epilogue in the wrapper: combine per-core partials and take the mean.
    partials = out[::8, 0]
    return jnp.sum(partials) / jnp.float32(n)


def _reference_loss(x, labels, weight, bias):
    logits = x.reshape(-1, 128) @ weight.T + bias[None, :]
    lab = labels.reshape(-1)
    lse = jax.scipy.special.logsumexp(logits, axis=-1)
    picked = jnp.take_along_axis(logits, lab[:, None], axis=-1)[:, 0]
    return jnp.mean(lse - picked)


if __name__ == "__main__":
    key = jax.random.PRNGKey(0)
    kx, kl, kw, kb = jax.random.split(key, 4)

    B, S, H, C = 2, 8, 128, 2                      # hidden=128, 2 classes (fixed by module)
    x = jax.random.normal(kx, (B, S, H), dtype=jnp.float32)
    labels = jax.random.randint(kl, (B, S), 0, C, dtype=jnp.int32)

    # Deterministic Linear(128, 2) init (PyTorch-style uniform(-1/sqrt(in), 1/sqrt(in))).
    bound = 1.0 / jnp.sqrt(jnp.float32(H))
    weight = jax.random.uniform(kw, (C, H), minval=-bound, maxval=bound, dtype=jnp.float32)
    bias = jax.random.uniform(kb, (C,), minval=-bound, maxval=bound, dtype=jnp.float32)

    loss = aux_visual_loss(x, labels, weight, bias)
    loss = jax.block_until_ready(loss)

    ref = _reference_loss(x, labels, weight, bias)
    assert jnp.allclose(loss, ref, rtol=1e-5, atol=1e-5), (loss, ref)
    print("KERNEL_OK")
</pallas_src>

<mosaic_0001>
module attributes {stable_mosaic.version = 11 : i64} {
  func.func @_aux_loss_kernel(%arg0: i32, %arg1: i32, %arg2: memref<16x128xf32, #tpu.memory_space<vmem>>, %arg3: memref<128x1xf32, #tpu.memory_space<vmem>>, %arg4: memref<1x1xf32, #tpu.memory_space<vmem>>, %arg5: memref<16x1xi32, #tpu.memory_space<vmem>>, %arg6: memref<8x128xf32, #tpu.memory_space<vmem>>, %arg7: memref<1x1xf32, #tpu.memory_space<vmem>>) attributes {dimension_semantics = [#tpu.dimension_semantics<parallel>, #tpu.dimension_semantics<arbitrary>], iteration_bounds = array<i64: 2, 1>, scalar_prefetch = 0 : i64, scratch_operands = 1 : i64, tpu.core_type = #tpu.core_type<tc>, window_params = [{transform_indices = @transform_0, window_bounds = array<i64: 16, 128>}, {pipeline_mode = #tpu.pipeline_mode<synchronous>, transform_indices = @transform_1, window_bounds = array<i64: 128, 1>}, {pipeline_mode = #tpu.pipeline_mode<synchronous>, transform_indices = @transform_2, window_bounds = array<i64: 1, 1>}, {transform_indices = @transform_3, window_bounds = array<i64: 16, 1>}, {transform_indices = @transform_4, window_bounds = array<i64: 8, 128>}]} {
    %c0_i32 = arith.constant 0 : i32
    %0 = arith.cmpi eq, %arg1, %c0_i32 : i32
    %1 = arith.extui %0 : i1 to i32
    %c0_i32_0 = arith.constant 0 : i32
    %2 = arith.cmpi ne, %1, %c0_i32_0 : i32
    scf.if %2 {
      %cst_23 = arith.constant 0.000000e+00 : f32
      %49 = vector.broadcast %cst_23 : f32 to vector<1x1xf32>
      %c0_24 = arith.constant 0 : index
      %c0_25 = arith.constant 0 : index
      %50 = vector.load %arg7[%c0_24, %c0_25] : memref<1x1xf32, #tpu.memory_space<vmem>>, vector<1x1xf32>
      tpu.vector_store %arg7[%c0_24, %c0_25], %49 {strides = array<i32>} : memref<1x1xf32, #tpu.memory_space<vmem>>, vector<1x1xf32>,
    } else {
    }
    %c0 = arith.constant 0 : index
    %c0_1 = arith.constant 0 : index
    %3 = vector.load %arg2[%c0, %c0_1] : memref<16x128xf32, #tpu.memory_space<vmem>>, vector<16x128xf32>
    %c0_2 = arith.constant 0 : index
    %c0_3 = arith.constant 0 : index
    %4 = vector.load %arg3[%c0_2, %c0_3] : memref<128x1xf32, #tpu.memory_space<vmem>>, vector<128x1xf32>
    %cst = arith.constant dense<0.000000e+00> : vector<16x1xf32>
    %5 = tpu.matmul %3, %4, %cst {dimension_numbers = #tpu.dot_dimension_numbers<[1], [0], [0], [1], [0, 0, 1, 1], [], []>} : vector<16x128xf32>, vector<128x1xf32>, vector<16x1xf32> -> vector<16x1xf32>
    %c0_4 = arith.constant 0 : index
    %c0_5 = arith.constant 0 : index
    %6 = vector.load %arg4[%c0_4, %c0_5] : memref<1x1xf32, #tpu.memory_space<vmem>>, vector<1x1xf32>
    %7 = vector.broadcast %6 : vector<1x1xf32> to vector<16x1xf32>
    %8 = arith.addf %5, %7 : vector<16x1xf32>
    %c0_6 = arith.constant 0 : index
    %c0_7 = arith.constant 0 : index
    %9 = vector.load %arg5[%c0_6, %c0_7] : memref<16x1xi32, #tpu.memory_space<vmem>>, vector<16x1xi32>
    %10 = arith.sitofp %9 : vector<16x1xi32> to vector<16x1xf32>
    %cst_8 = arith.constant 2.000000e+00 : f32
    %11 = vector.broadcast %cst_8 : f32 to vector<16x1xf32>
    %12 = arith.mulf %11, %10 : vector<16x1xf32>
    %cst_9 = arith.constant 1.000000e+00 : f32
    %13 = vector.broadcast %cst_9 : f32 to vector<16x1xf32>
    %14 = arith.subf %13, %12 : vector<16x1xf32>
    %15 = arith.mulf %14, %8 : vector<16x1xf32>
    %c1_i32 = arith.constant 1 : i32
    %16 = arith.muli %arg0, %c1_i32 : i32
    %17 = arith.addi %16, %arg1 : i32
    %c16_i32 = arith.constant 16 : i32
    %18 = arith.muli %17, %c16_i32 : i32
    %19 = tpu.iota {dimensions = array<i32: 0>} : vector<16x1xi32>
    %20 = vector.broadcast %18 : i32 to vector<16x1xi32>
    %21 = arith.addi %20, %19 : vector<16x1xi32>
    %c16_i32_10 = arith.constant 16 : i32
    %22 = vector.broadcast %c16_i32_10 : i32 to vector<16x1xi32>
    %23 = arith.cmpi slt, %21, %22 : vector<16x1xi32>
    %cst_11 = arith.constant 0.000000e+00 : f32
    %24 = vector.broadcast %cst_11 : f32 to vector<16x1xf32>
    %25 = arith.select %23, %15, %24 : vector<16x1xi1>, vector<16x1xf32>
    %cst_12 = arith.constant 0.000000e+00 : f32
    %26 = vector.broadcast %cst_12 : f32 to vector<16x1xf32>
    %27 = arith.maximumf %25, %26 : vector<16x1xf32>
    %28 = math.absf %25 : vector<16x1xf32>
    %cst_13 = arith.constant 0.000000e+00 : f32
    %29 = vector.broadcast %cst_13 : f32 to vector<16x1xf32>
    %30 = arith.subf %29, %28 : vector<16x1xf32>
    %31 = math.exp %30 : vector<16x1xf32>
    %cst_14 = arith.constant 1.000000e+00 : f32
    %32 = vector.broadcast %cst_14 : f32 to vector<16x1xf32>
    %33 = arith.addf %32, %31 : vector<16x1xf32>
    %34 = math.log %33 : vector<16x1xf32>
    %35 = arith.addf %27, %34 : vector<16x1xf32>
    %c0_15 = arith.constant 0 : index
    %c0_16 = arith.constant 0 : index
    %36 = vector.load %arg7[%c0_15, %c0_16] : memref<1x1xf32, #tpu.memory_space<vmem>>, vector<1x1xf32>
    %cst_17 = arith.constant 0.000000e+00 : f32
    %37 = vector.broadcast %cst_17 : f32 to vector<16x1xf32>
    %38 = arith.select %23, %35, %37 : vector<16x1xi1>, vector<16x1xf32>
    %39 = vector.shape_cast %38 : vector<16x1xf32> to vector<1x16x1xf32>
    %cst_18 = arith.constant dense<0.000000e+00> : vector<1xf32>
    %40 = vector.multi_reduction <add>, %39, %cst_18 [1, 2] : vector<1x16x1xf32> to vector<1xf32>
    %41 = vector.shape_cast %40 : vector<1xf32> to vector<1x1x1xf32>
    %42 = vector.extract %41[0, 0, 0] : f32 from vector<1x1x1xf32>
    %43 = vector.broadcast %42 : f32 to vector<1x1xf32>
    %44 = arith.addf %36, %43 : vector<1x1xf32>
    %c0_19 = arith.constant 0 : index
    %c0_20 = arith.constant 0 : index
    %45 = vector.load %arg7[%c0_19, %c0_20] : memref<1x1xf32, #tpu.memory_space<vmem>>, vector<1x1xf32>
    tpu.vector_store %arg7[%c0_19, %c0_20], %44 {strides = array<i32>} : memref<1x1xf32, #tpu.memory_space<vmem>>, vector<1x1xf32>,
    %c0_i32_21 = arith.constant 0 : i32
    %46 = arith.cmpi eq, %arg1, %c0_i32_21 : i32
    %47 = arith.extui %46 : i1 to i32
    %c0_i32_22 = arith.constant 0 : i32
    %48 = arith.cmpi ne, %47, %c0_i32_22 : i32
    scf.if %48 {
      %c0_23 = arith.constant 0 : index
      %c0_24 = arith.constant 0 : index
      %49 = vector.load %arg7[%c0_23, %c0_24] : memref<1x1xf32, #tpu.memory_space<vmem>>, vector<1x1xf32>
      %50 = vector.shape_cast %49 : vector<1x1xf32> to vector<1x1xf32>
      %51 = vector.broadcast %50 : vector<1x1xf32> to vector<8x128xf32>
      %c0_25 = arith.constant 0 : index
      %c0_26 = arith.constant 0 : index
      %52 = vector.load %arg6[%c0_25, %c0_26] : memref<8x128xf32, #tpu.memory_space<vmem>>, vector<8x128xf32>
      tpu.vector_store %arg6[%c0_25, %c0_26], %51 {strides = array<i32>} : memref<8x128xf32, #tpu.memory_space<vmem>>, vector<8x128xf32>,
    } else {
    }
    return
  }
  func.func @transform_0(%arg0: i32, %arg1: i32) -> (i32, i32) {
    %c1_i32 = arith.constant 1 : i32
    %0 = arith.muli %arg0, %c1_i32 : i32
    %1 = arith.addi %0, %arg1 : i32
    %c0_i32 = arith.constant 0 : i32
    %2 = arith.minsi %1, %c0_i32 : i32
    %c0_i32_0 = arith.constant 0 : i32
    %c0_i32_1 = arith.constant 0 : i32
    return %2, %c0_i32_0 : i32, i32
  }
  func.func @transform_1(%arg0: i32, %arg1: i32) -> (i32, i32) {
    %c0_i32 = arith.constant 0 : i32
    %c0_i32_0 = arith.constant 0 : i32
    %c0_i32_1 = arith.constant 0 : i32
    return %c0_i32, %c0_i32_0 : i32, i32
  }
  func.func @transform_2(%arg0: i32, %arg1: i32) -> (i32, i32) {
    %c0_i32 = arith.constant 0 : i32
    %c0_i32_0 = arith.constant 0 : i32
    %c0_i32_1 = arith.constant 0 : i32
    return %c0_i32, %c0_i32_0 : i32, i32
  }
  func.func @transform_3(%arg0: i32, %arg1: i32) -> (i32, i32) {
    %c1_i32 = arith.constant 1 : i32
    %0 = arith.muli %arg0, %c1_i32 : i32
    %1 = arith.addi %0, %arg1 : i32
    %c0_i32 = arith.constant 0 : i32
    %2 = arith.minsi %1, %c0_i32 : i32
    %c0_i32_0 = arith.constant 0 : i32
    %c0_i32_1 = arith.constant 0 : i32
    return %2, %c0_i32_0 : i32, i32
  }
  func.func @transform_4(%arg0: i32, %arg1: i32) -> (i32, i32) {
    %c0_i32 = arith.constant 0 : i32
    %c0_i32_0 = arith.constant 0 : i32
    return %arg0, %c0_i32 : i32, i32
  }
}

</mosaic_0001>

<bundles_post_ra>
// kernel: tpu_custom_call.1
= control target key start
LH: loop header
LB: loop body
LE: loop exit
PB: predicated region body
PF: predicated region fallthrough
CT: control target
= control target key end

     0   :  { %s970_s0 = inlined_call_operand.vmem [shape: f32[16,128], index: 0, kind: input, shape index: {}]   ;;  %s971_s1 = inlined_call_operand.vmem [shape: f32[128,1], index: 1, kind: input, shape index: {}]   ;;  %s972_s2 = inlined_call_operand.<no memory space> [shape: f32[1,1], index: 2, kind: input, shape index: {}]   ;;  %s973_s3 = inlined_call_operand.vmem [shape: s32[16,1], index: 3, kind: input, shape index: {}]   ;;  %s974_s4 = inlined_call_operand.hbm [shape: f32[16,128], index: 4, kind: output, shape index: {}]  }
   0x1   :  { %v9_v0 = vstv %s972_s2 }
   0x2   :  { %10 = vst [vmem:[#allocation3] sm:$0x1] %v9_v0 }
   0x3   :  { %11 = vsyncpa [#allocation5], 0 }
   0x4   :  { %13 = vsyncpa [#allocation5 + $0x1], 0  ;;  %s796_s17 = smov 0   ;;  %s798_s18 = smov 0  }
   0x5   :  { %s800_s19 = smov 0   ;;  %s802_s20 = smov 0  }
   0x6   :  { %s804_s21 = smov 0   ;;  %s806_s22 = smov 0  }
   0x7 LB: > { %s549_s2 = sadd.s32 4294967295, %s763_s22   ;;  %s550_s23 = sadd.s32 4294967294, %s763_s22   ;;  %s763_s22 = sphi %s806_s22, %s19_s22   ;;  %s759_s21 = sphi %s804_s21, %s981_s21   ;;  %s755_s20 = sphi %s802_s20, %s980_s20   ;;  %s751_s19 = sphi %s800_s19, %s979_s19   ;;  %s747_s18 = sphi %s798_s18, %s978_s18   ;;  %s743_s17 = sphi %s796_s17, %s977_s17  }
   0x8   : > { %s31_s24 = sadd.s32 1, %s759_s21  ;;  %s144_s25 = sadd.s32 1, %s751_s19 }
   0x9   : > { %p33_p0 = scmp.ge.s32.totalorder %s31_s24, 2  ;;  %p154_p1 = scmp.ne.s32.totalorder %s751_s19, %s747_s18 }
   0xa   : > { %p155_p2 = scmp.eq.s32.totalorder %s549_s2, 1  ;;  %p160_p3 = scmp.ne.s32.totalorder %s747_s18, %s743_s17 }
   0xb   : > { %s983_s24 = smov (%p33_p0, %s31_s24), 0  ;;  %p161_p5 = scmp.eq.s32.totalorder %s550_s23, 1 }
   0xc   : > { %p836_p4 = por %p155_p2, %p154_p1  ;;  %s141_s27 = ssub.s32 %s759_s21, %s983_s24 }
   0xd   : > { %p553_p6 = scmp.ge.s32.totalorder %s763_s22, 1  ;;  %p142_p7 = scmp.eq.s32.totalorder %s141_s27, 0 }
   0xe   : > { %p843_p8 = por %p161_p5, %p160_p3  ;;  %p215_p9 = scmp.lt.s32.totalorder %s763_s22, 3 }
   0xf   : > { %s849_s29 = scalar_select %p142_p7, %s751_s19, %s144_s25  }
  0x10   : > { %p216_p10 = pnand %p553_p6, %p215_p9 }
  0x11   : > { %p253_p11 = scmp.lt.s32.totalorder (!%p216_p10), %s755_s20, 0  ;;  %s560_s15 = sshll.u32 (!%p216_p10), %s755_s20, 4 }
  0x12   : > { %219 = sbr.rel (%p216_p10) target bundleno = 648 (0x288), region = 36  ;;  %s563_s25 = sshll.u32 (!%p216_p10), %s755_s20, 7 }
  0x13   : > { %s468_s5 = scalar_lea.hbm (!%p216_p10), %s974_s4, %s563_s25  ;;  %s767_s9 = smov (!%p216_p10), [#allocation4]  }
  0x17   : > { %v299_v1 = vld [vmem:[%s971_s1 + $0x78] sm:$0xff]  ;;  %v298_v2 = vld [vmem:[%s971_s1 + $0x70] sm:$0xff]  ;;  %v297_v3 = vld [vmem:[%s971_s1 + $0x68] sm:$0xff]  ;;  %s254_s10 = scalar_select %p253_p11, %s755_s20, 0  ;;  %v394_v19 = vlaneseq  ;;  %v397_v27 = vstv %s560_s15  ;;  %vm425_vm2 = vcmask 7168   ;;  %vm280_vm3 = vcmask 0  }
  0x18   : > { %584 = vmatprep.subr.mxu0 %v299_v1  ;;  %v296_v4 = vld [vmem:[%s971_s1 + $0x60] sm:$0xff]  ;;  %v295_v5 = vld [vmem:[%s971_s1 + $0x58] sm:$0xff]  ;;  %v294_v6 = vld [vmem:[%s971_s1 + $0x50] sm:$0xff] }
  0x19   : > { %585 = vmatpush3.msra.mxu0 %v299_v1  ;;  %s555_s13 = sshll.u32 %s254_s10, 1  ;;  %v293_v7 = vld [vmem:[%s971_s1 + $0x48] sm:$0xff]  ;;  %v292_v9 = vld [vmem:[%s971_s1 + $0x40] sm:$0xff]  ;;  %v291_v10 = vld [vmem:[%s971_s1 + $0x38] sm:$0xff]  ;;  %v395_v22 = vshrl.u32 %v394_v19, 7  ;;  %v765_v1 = vmov 0.0  }
  0x1a   : > { %586 = vmatprep.subr.mxu0 %v298_v2  ;;  %p256_p12 = scmp.lt.s32.totalorder %s555_s13, 1  ;;  %v290_v11 = vld [vmem:[%s971_s1 + $0x30] sm:$0xff]  ;;  %v289_v12 = vld [vmem:[%s971_s1 + $0x28] sm:$0xff]  ;;  %v288_v13 = vld [vmem:[%s971_s1 + $0x20] sm:$0xff]  ;;  %281 = vst.msk [vmem:[#allocation2] sm:$0x1] %vm280_vm3, %v765_v1 }
  0x1b   : > { %587 = vmatpush3.msra.mxu0 %v298_v2  ;;  %v287_v14 = vld [vmem:[%s971_s1 + $0x18] sm:$0xff]  ;;  %v286_v15 = vld [vmem:[%s971_s1 + $0x10] sm:$0xff]  ;;  %v285_v16 = vld [vmem:[%s971_s1 + $0x8] sm:$0xff]  ;;  %v396_v25 = vadd.s32 8, %v395_v22  ;;  %v398_v33 = vadd.s32 %v397_v27, %v395_v22  ;;  %v766_v2 = vmov 0   ;;  %s691_s10 = sshll.u32 %s767_s9, 4  ;;  %s692_s10 = int_to_ptr.vmem [resolvable:$false] %s691_s10 }
  0x1c   : > { %588 = vmatprep.subr.mxu0 %v297_v3  ;;  %s985_s13 = smov (!%p256_p12, %s555_s13), 1  ;;  %v284_v17 = vld [vmem:[%s971_s1] sm:$0xff]  ;;  %678 = vset.pattern.permute.xlu0 %v766_v2  ;;  %s693_s20 = scalar_lea.vmem %s692_s10, 256 }
  0x1d   : > { %589 = vmatpush3.msra.mxu0 %v297_v3  ;;  %s556_s23 = sshll.u32 %s985_s13, 3  ;;  %v559_v29 = vld [vmem:[#allocation3] ss:$0 sm:$0xff]  ;;  %v399_v30 = vadd.s32 %v397_v27, %v396_v25  ;;  %vm400_vm1 = vcmp.lt.s32.totalorder %v398_v33, 16 }
  0x1e   : > { %590 = vmatprep.subr.mxu0 %v296_v4  ;;  %s882_s6 = scalar_lea.vmem %s970_s0, %s556_s23  ;;  %s271_s14 = scalar_lea.vmem %s973_s3, %s556_s23 }
  0x1f   : > { %591 = vmatpush3.msra.mxu0 %v296_v4  ;;  %v282_v8 = vld [vmem:[%s882_s6] sm:$0xff]  ;;  %v283_v18 = vld [vmem:[%s882_s6 + $0x8] sm:$0xff]  ;;  %vm401_vm0 = vcmp.lt.s32.totalorder %v399_v30, 16  ;;  %s249_s23 = sand.u32 1, %s747_s18  }
  0x20   : > { %592 = vmatprep.subr.mxu0 %v295_v5  ;;  %616 = vmatprep.mubr.f32.mxu0 %v282_v8  ;;  %v383_v20 = vld [vmem:[%s271_s14 + $0x8] sm:$0xff]  ;;  %v382_v21 = vld [vmem:[%s271_s14] sm:$0xff]  ;;  %s554_s6 = sshll.u32 %s249_s23, 3  ;;  %s457_s7 = scalar_lea.sflag [#allocation5], %s249_s23 }
  0x21   : > { %593 = vmatpush3.msra.mxu0 %v295_v5  ;;  %v385_v23 = vcvt.s32.f32 %v383_v20  ;;  %v384_v24 = vcvt.s32.f32 %v382_v21  ;;  %s251_s16 = scalar_lea.vmem [#allocation4], %s554_s6 }
  0x22   : > { %594 = vmatprep.subr.mxu0 %v294_v6  ;;  %s470_s2 = sshll.u32 %s251_s16, 4  ;;  %s927_s2 = int_to_ptr.vmem [resolvable:$true] %s470_s2 }
  0x23   : > { %595 = vmatpush3.msra.mxu0 %v294_v6  ;;  %v387_v26 = vmul.f32 2.0, %v385_v23  ;;  %v386_v28 = vmul.f32 2.0, %v384_v24  ;;  %s687_s8 = scalar_lea.vmem %s927_s2, 128  ;;  %p694_p2 = scmp.lt.s32.totalorder %s927_s2, %s692_s10 }
  0x24   : > { %596 = vmatprep.subr.mxu0 %v293_v7  ;;  %p688_p13 = scmp.ne.s32.totalorder %s927_s2, %s687_s8  ;;  %p695_p3 = scmp.lt.s32.totalorder %s693_s20, %s687_s8 }
  0x25   : > { %597 = vmatpush3.msra.mxu0 %v293_v7  ;;  %v389_v31 = vsub.f32 1.0, %v387_v26  ;;  %v388_v35 = vsub.f32 1.0, %v386_v28 }
  0x26   : > { %598 = vmatprep.subr.mxu0 %v292_v9  ;;  %p689_p0 = pnand %p688_p13, %p836_p4  ;;  %p696_p5 = por %p695_p3, %p694_p2 }
  0x27   : > { %599 = vmatpush3.msra.mxu0 %v292_v9 }
  0x28   : > { %600 = vmatprep.subr.mxu0 %v291_v10  ;;  %p690_p1 = pneg %p689_p0 }
  0x29   : > { %601 = vmatpush3.msra.mxu0 %v291_v10  ;;  %v422_v10 = vld [vmem:[#allocation2] sm:$0x1] }
  0x2a   : > { %602 = vmatprep.subr.mxu0 %v290_v11  ;;  %p697_p6 = pnand %p696_p5, %p690_p1 }
  0x2b   : > { %603 = vmatpush3.msra.mxu0 %v290_v11 }
  0x2c   : > { %604 = vmatprep.subr.mxu0 %v289_v12 }
  0x2d   : > { %605 = vmatpush3.msra.mxu0 %v289_v12 }
  0x2e   : > { %606 = vmatprep.subr.mxu0 %v288_v13 }
  0x2f   : > { %607 = vmatpush3.msra.mxu0 %v288_v13 }
  0x30   : > { %608 = vmatprep.subr.mxu0 %v287_v14 }
  0x31   : > { %609 = vmatpush3.msra.mxu0 %v287_v14 }
  0x32   : > { %610 = vmatprep.subr.mxu0 %v286_v15 }
  0x33   : > { %611 = vmatpush3.msra.mxu0 %v286_v15 }
  0x34   : > { %612 = vmatprep.subr.mxu0 %v285_v16 }
  0x35   : > { %613 = vmatpush3.msra.mxu0 %v285_v16 }
  0x36   : > { %614 = vmatprep.subr.mxu0 %v284_v17 }
  0x37   : > { %615 = vmatpush3.msra.mxu0 %v284_v17 }
  0x38   : > { %617 = vmatmul.mubr.f32.vlgmr.msra.gmra.mxu0 %v283_v18 }
  0xf8   : > { %v618_v32 = vpop.f32.mrf.mxu0 }
  0xf9   : > { %v379_v34 = vadd.f32 %v618_v32, %v559_v29 }
  0xfa   : > { %v373_v36 = vpop.f32.mrf.mxu0 }
  0xfb   : > { %v391_v37 = vmul.f32 %v389_v31, %v379_v34  ;;  %v374_v38 = vadd.f32 %v559_v29, %v373_v36 }
  0xfd   : > { %v390_v39 = vmul.f32 %v388_v35, %v374_v38  ;;  %v403_v40 = vsel %vm401_vm0, %v391_v37, 0.0 }
  0xfe   : > { %v407_v41 = vand.u32 2147483647, %v403_v40  ;;  %v405_v53 = vmax.f32 %v403_v40, 0.0 }
  0xff   : > { %v402_v42 = vsel %vm400_vm1, %v390_v39, 0.0 }
 0x100   : > { %v406_v43 = vand.u32 2147483647, %v402_v42  ;;  %v409_v44 = vsub.f32 0.0, %v407_v41  ;;  %v404_v56 = vmax.f32 %v402_v42, 0.0 }
 0x102   : > { %v408_v45 = vsub.f32 0.0, %v406_v43  ;;  %v412_v46 = vmul.f32 1.442695, %v409_v44 }
 0x104   : > { %v410_v47 = vmul.f32 1.442695, %v408_v45  ;;  %679 = vpow2.f32 %v412_v46 }
 0x106   : > { %681 = vpow2.f32 %v410_v47 }
 0x111   : > { %v680_v48 = vpop.eup %679 }
 0x112   : > { %v415_v49 = vadd.f32 1.0, %v680_v48 }
 0x113   : > { %v682_v50 = vpop.eup %681 }
 0x114   : > { %v414_v51 = vadd.f32 1.0, %v682_v50  ;;  %683 = vlog2.f32 %v415_v49 }
 0x116   : > { %685 = vlog2.f32 %v414_v51 }
 0x121   : > { %v684_v52 = vpop.eup %683 }
 0x122   : > { %v419_v54 = vmul.f32 0.6931472, %v684_v52 }
 0x123   : > { %v686_v55 = vpop.eup %685 }
 0x124   : > { %v417_v57 = vmul.f32 0.6931472, %v686_v55  ;;  %v421_v58 = vadd.f32 %v419_v54, %v405_v53 }
 0x126   : > { %v420_v59 = vadd.f32 %v417_v57, %v404_v56  ;;  %v424_v60 = vsel %vm401_vm0, %v421_v58, 0.0 }
 0x127   : > { %v427_v63 = vsel %vm425_vm2, %v424_v60, 0.0 }
 0x128   : > { %v423_v61 = vsel %vm400_vm1, %v420_v59, 0.0 }
 0x129   : > { %v426_v62 = vsel %vm425_vm2, %v423_v61, 0.0 }
 0x12a   : > { %v428_v0 = vadd.f32 %v427_v63, %v426_v62 }
 0x12c   : > { %429 = vadd.xlane.f32.xlu0 %v428_v0 }
 0x1b5   : > { %v430_v3 = vpop.xlane.xlu0 %429 }
 0x1b6   : > { %v431_v4 = vrot.slane %v430_v3, 4 }
 0x1b8   : > { %v432_v5 = vadd.f32 %v431_v4, %v430_v3 }
 0x1ba   : > { %v433_v6 = vrot.slane %v432_v5, 2 }
 0x1bc   : > { %v434_v7 = vadd.f32 %v433_v6, %v432_v5 }
 0x1be   : > { %v435_v8 = vrot.slane %v434_v7, 1 }
 0x1c0   : > { %v436_v9 = vadd.f32 %v435_v8, %v434_v7 }
 0x1c2   : > { %619 = vpush %v436_v9 }
 0x1f3   : > { %s620_s13 = spop %619 }
 0x1f4   : > { %v438_v11 = vstv %s620_s13 }
 0x1f5   : > { %v439_v12 = vadd.f32 %v438_v11, %v422_v10 }
 0x1f7   : > { %441 = vst.msk [vmem:[#allocation2] sm:$0x1] %vm280_vm3, %v439_v12 }
 0x1fe   : > { %v561_v13 = vld [vmem:[#allocation2] ss:$0 sm:$0xff] }
 0x1ff   : > { %452 = vperm.xlu0 %678, %v561_v13  }
 0x27a   : > { %v453_v14 = vpop.permute.xlu0 %452 }
 0x27b   : > { %455 = vst [vmem:[%s251_s16] sm:$0xff] %v453_v14 }
 0x27c   : > { %700 = shalt.err (!%p697_p6)
}
 0x27d   : > { %s701_s11 = scalar_lea.hbm %s468_s5, 128  ;;  %s705_s15 = scalar_lea.hbm %s974_s4, 256 }
 0x27e   : > { %p702_p7 = scmp.ne.s32.totalorder %s468_s5, %s701_s11  ;;  %p706_p11 = scmp.lt.s32.totalorder %s468_s5, %s974_s4 }
 0x27f   : > { %p707_p12 = scmp.lt.s32.totalorder %s705_s15, %s701_s11 }
 0x280   : > { %p703_p9 = pnand %p702_p7, %p836_p4 }
 0x281   : > { %p708_p13 = por %p707_p12, %p706_p11 }
 0x282   : > { %p704_p10 = pneg %p703_p9 }
 0x284   : > { %p709_p0 = pnand %p708_p13, %p704_p10 }
 0x286   : > { %712 = shalt.err (!%p709_p0)
}
 0x287   : > { %621 = dma.vmem_to_hbm [thread:$0]  (%p836_p4), %s927_s2, 128, %s468_s5, %s457_s7  }
 0x288 PF: > { %p627_p1 = scmp.ge.s32.totalorder %s763_s22, 2  ;;  %s482_s6 = sand.u32 1, %s743_s17  }
 0x289   : > { %s483_s16 = scalar_lea.sflag [#allocation5], %s482_s6 }
 0x28a   : > { %p624_p2 = pnand %p627_p1, %p843_p8 }
 0x28c   : > { %p625_p3 = pneg %p624_p2 }
 0x28e   : > { %738 = dma.done.wait (%p625_p3), %s483_s16, 128  }
 0x28f   : > { %740 = vsyncadd (%p625_p3), %s483_s16, 4294967168  ;;  %s19_s22 = sadd.s32 1, %s763_s22   ;;  %s977_s17 = smov %s747_s18 }
 0x290   : > { %p16_p5 = scmp.ge.s32.totalorder %s19_s22, 4   ;;  %s978_s18 = smov %s751_s19 }
 0x291   : > { %s979_s19 = smov %s849_s29  ;;  %s980_s20 = smov %s759_s21 }
 0x292   : > { %s981_s21 = smov %s983_s24  ;;  %18 = sbr.rel (!%p16_p5) target bundleno = 7 (0x7), region = 82 }
 0x297   :  { %488 = vsyncpa [#allocation5], 1 }
 0x298   :  { %490 = vsyncpa [#allocation5 + $0x1], 1 }

</bundles_post_ra>
